<compile_context>
chip_gen: v6e
topology: v6e:2x2x1
jax: 0.10.0
libtpu: 0.0.40
codegen_flags: <defaults>
</compile_context>

<pallas_src>
import functools

import jax
import jax.numpy as jnp
from jax import lax
from jax.experimental import pallas as pl
from jax.experimental.pallas import tpu as pltpu


def _residual_kernel(x_ref, w1_ref, s1_ref, b1_ref,
                     w2_ref, s2_ref, b2_ref,
                     wsk_ref, ssk_ref, bsk_ref,
                     o_ref, xpad_ref, midpad_ref):
    # x_ref   : (block_n, H, W*Cin)       lane-packed input images
    # w1_ref  : (3, W*Cin,  W*Cout)       banded conv1 weights (dx + W-pad folded in)
    # w2_ref  : (3, W*Cout, W*Cout)       banded conv2 weights
    # wsk_ref : (W*Cin, W*Cout)           block-diagonal 1x1 skip conv
    # s*/b*   : (1, W*Cout)               lane-packed folded BN scale / bias
    # o_ref   : (block_n, H, W*Cout)      lane-dense output
    # xpad_ref  : (H+2, W*Cin)  VMEM scratch (H-halo padded input)
    # midpad_ref: (H+2, W*Cout) VMEM scratch (H-halo padded relu1 output)
    block_n, H, WCin = x_ref.shape
    WCout = o_ref.shape[2]
    cdt = w1_ref.dtype  # matmul operand dtype (f32 or bf16)

    # Hoisted, lane-packed BN scale/bias (read once per grid step).
    s1 = s1_ref[...]
    bb1 = b1_ref[...]
    s2 = s2_ref[...]
    bb2 = b2_ref[...]
    ssk = ssk_ref[...]
    bbsk = bsk_ref[...]

    # Zero only the 2 halo rows of each padded scratch; the interior is fully
    # overwritten for every image below.  (Done every step so megacore grid
    # splitting on v7x stays correct.)
    xpad_ref[0:1, :] = jnp.zeros((1, WCin), jnp.float32)
    xpad_ref[H + 1:H + 2, :] = jnp.zeros((1, WCin), jnp.float32)
    midpad_ref[0:1, :] = jnp.zeros((1, WCout), jnp.float32)
    midpad_ref[H + 1:H + 2, :] = jnp.zeros((1, WCout), jnp.float32)

    for b in range(block_n):  # static unroll over images in this block
        xin = x_ref[b]                       # (H, W*Cin)
        xpad_ref[1:H + 1, :] = xin

        # ---- conv1 (3x3, pad 1): 3 banded matmuls, K = W*Cin, N = W*Cout ----
        acc1 = jnp.zeros((H, WCout), jnp.float32)
        for dy in range(3):
            acc1 = acc1 + jnp.dot(xpad_ref[dy:dy + H, :].astype(cdt),
                                  w1_ref[dy],
                                  preferred_element_type=jnp.float32)
        # BN1 (folded) + ReLU, lane-dense
        y1 = jnp.maximum(acc1 * s1 + bb1, 0.0)

        midpad_ref[1:H + 1, :] = y1          # full-lane store, sublane offset 1

        # ---- conv2 (3x3, pad 1): 3 banded matmuls, K = N = W*Cout ----------
        acc2 = jnp.zeros((H, WCout), jnp.float32)
        for dy in range(3):
            acc2 = acc2 + jnp.dot(midpad_ref[dy:dy + H, :].astype(cdt),
                                  w2_ref[dy],
                                  preferred_element_type=jnp.float32)
        z = acc2 * s2 + bb2                  # BN2 (folded)

        # ---- skip: block-diagonal 1x1 conv + BN ------------------------------
        sk = jnp.dot(xin.astype(cdt), wsk_ref[...],
                     preferred_element_type=jnp.float32) * ssk + bbsk

        # ---- residual add + ReLU, lane-dense store --------------------------
        o_ref[b] = jnp.maximum(z + sk, 0.0)


def _banded_conv_weights(w, Wdim):
    """PyTorch (Cout, Cin, 3, 3) conv weight -> (3, W*Cin, W*Cout) banded matrices.

    Row `dy` is a banded matrix whose block (wi, wo) holds the (Cin, Cout) tap
    for dx = wi - wo + 1; out-of-range blocks are zero, which also implements
    the W-direction zero padding.
    """
    Cout, Cin = w.shape[0], w.shape[1]
    wt = jnp.transpose(w, (2, 3, 1, 0)).astype(jnp.float32)  # (3, 3, Cin, Cout)
    wi = jnp.arange(Wdim)[:, None]
    wo = jnp.arange(Wdim)[None, :]
    dx = wi - wo + 1
    valid = (dx >= 0) & (dx <= 2)
    dxc = jnp.clip(dx, 0, 2)

    def one_row(wt_dy):                                      # (3, Cin, Cout)
        blocks = wt_dy[dxc]                                  # (W, W, Cin, Cout)
        blocks = jnp.where(valid[:, :, None, None], blocks, 0.0)
        return blocks.transpose(0, 2, 1, 3).reshape(Wdim * Cin, Wdim * Cout)

    return jnp.stack([one_row(wt[dy]) for dy in range(3)])   # (3, W*Cin, W*Cout)


def _fold_bn(gamma, beta, mean, var, Wdim, eps=1e-5):
    """Fold BN running stats into lane-packed (1, W*C) scale/bias."""
    scale = gamma / jnp.sqrt(var + eps)
    bias = beta - mean * scale
    return (jnp.tile(scale, Wdim).reshape(1, -1).astype(jnp.float32),
            jnp.tile(bias, Wdim).reshape(1, -1).astype(jnp.float32))


@functools.partial(jax.jit, static_argnames=("block_n", "matmul_dtype"))
def residual_forward(x_nchw, params, block_n=1, matmul_dtype=jnp.float32):
    """Forward pass of `residual` (stride=1, inp_dim != out_dim => 1x1+BN skip).

    x_nchw: (N, Cin, H, W) float32 (PyTorch layout). Returns (N, Cout, H, W).
    Set matmul_dtype=jnp.bfloat16 on v6e/v7x for 2x MXU throughput.
    """
    (w1, g1, b1, m1, v1,
     w2, g2, b2, m2, v2,
     wsk, gsk, bsk, msk, vsk) = params

    N, Cin, H, W = x_nchw.shape
    Cout = w1.shape[0]
    assert N % block_n == 0, "batch must be divisible by block_n"

    # NCHW -> (N, H, W*Cin) lane-packed layout (glue; no spatial padding here).
    x = jnp.transpose(x_nchw, (0, 2, 3, 1)).astype(jnp.float32)
    x = x.reshape(N, H, W * Cin)

    # Banded / block-diagonal weights with dx taps and W-padding folded in.
    w1_big = _banded_conv_weights(w1, W).astype(matmul_dtype)   # (3, W*Cin,  W*Cout)
    w2_big = _banded_conv_weights(w2, W).astype(matmul_dtype)   # (3, W*Cout, W*Cout)
    wsk_t = jnp.transpose(wsk, (2, 3, 1, 0)).reshape(Cin, Cout).astype(jnp.float32)
    wsk_big = jnp.einsum("ab,io->aibo", jnp.eye(W, dtype=jnp.float32), wsk_t)
    wsk_big = wsk_big.reshape(W * Cin, W * Cout).astype(matmul_dtype)

    s1, bb1 = _fold_bn(g1, b1, m1, v1, W)
    s2, bb2 = _fold_bn(g2, b2, m2, v2, W)
    ssk, bbsk = _fold_bn(gsk, bsk, msk, vsk, W)

    bn_spec = pl.BlockSpec((1, W * Cout), lambda n: (0, 0))

    out = pl.pallas_call(
        _residual_kernel,
        out_shape=jax.ShapeDtypeStruct((N, H, W * Cout), jnp.float32),
        grid_spec=pltpu.PrefetchScalarGridSpec(
            num_scalar_prefetch=0,
            grid=(N // block_n,),
            in_specs=[
                pl.BlockSpec((block_n, H, W * Cin), lambda n: (n, 0, 0)),
                pl.BlockSpec((3, W * Cin, W * Cout), lambda n: (0, 0, 0)),
                bn_spec, bn_spec,
                pl.BlockSpec((3, W * Cout, W * Cout), lambda n: (0, 0, 0)),
                bn_spec, bn_spec,
                pl.BlockSpec((W * Cin, W * Cout), lambda n: (0, 0)),
                bn_spec, bn_spec,
            ],
            out_specs=pl.BlockSpec((block_n, H, W * Cout), lambda n: (n, 0, 0)),
            scratch_shapes=[
                pltpu.VMEM((H + 2, W * Cin), jnp.float32),
                pltpu.VMEM((H + 2, W * Cout), jnp.float32),
            ],
        ),
        compiler_params=pltpu.CompilerParams(
            dimension_semantics=("parallel",)),
    )(x, w1_big, s1, bb1, w2_big, s2, bb2, wsk_big, ssk, bbsk)

    # (N, H, W*Cout) -> NCHW (glue).
    return jnp.transpose(out.reshape(N, H, W, Cout), (0, 3, 1, 2))


def _reference_forward(x_nchw, params):
    """Pure-JAX reference (inference-mode BN), NCHW in/out."""
    (w1, g1, b1, m1, v1,
     w2, g2, b2, m2, v2,
     wsk, gsk, bsk, msk, vsk) = params
    dn = ("NHWC", "HWIO", "NHWC")
    x = jnp.transpose(x_nchw, (0, 2, 3, 1))

    def conv(inp, w, pad):
        w_hwio = jnp.transpose(w, (2, 3, 1, 0))
        return lax.conv_general_dilated(inp, w_hwio, (1, 1),
                                        [(pad, pad), (pad, pad)],
                                        dimension_numbers=dn)

    def bn(y, g, b, m, v):
        return (y - m) / jnp.sqrt(v + 1e-5) * g + b

    y = jax.nn.relu(bn(conv(x, w1, 1), g1, b1, m1, v1))
    y = bn(conv(y, w2, 1), g2, b2, m2, v2)
    sk = bn(conv(x, wsk, 0), gsk, bsk, msk, vsk)
    out = jax.nn.relu(y + sk)
    return jnp.transpose(out, (0, 3, 1, 2))


if __name__ == "__main__":
    # residual(k=3, inp_dim=4, out_dim=8, stride=1) -> skip has 1x1 conv + BN
    N, Cin, Cout, H, W = 2, 4, 8, 16, 16

    key = jax.random.PRNGKey(0)
    ks = jax.random.split(key, 12)
    params = (
        0.1 * jax.random.normal(ks[0], (Cout, Cin, 3, 3), jnp.float32),   # conv1 w
        1.0 + 0.1 * jax.random.normal(ks[1], (Cout,), jnp.float32),       # bn1 gamma
        0.1 * jax.random.normal(ks[2], (Cout,), jnp.float32),             # bn1 beta
        0.05 * jax.random.normal(ks[3], (Cout,), jnp.float32),            # bn1 mean
        1.0 + 0.1 * jax.random.uniform(ks[4], (Cout,), jnp.float32),      # bn1 var
        0.1 * jax.random.normal(ks[5], (Cout, Cout, 3, 3), jnp.float32),  # conv2 w
        1.0 + 0.1 * jax.random.normal(ks[6], (Cout,), jnp.float32),       # bn2 gamma
        0.1 * jax.random.normal(ks[7], (Cout,), jnp.float32),             # bn2 beta
        0.05 * jax.random.normal(ks[8], (Cout,), jnp.float32),            # bn2 mean
        1.0 + 0.1 * jax.random.uniform(ks[9], (Cout,), jnp.float32),      # bn2 var
        0.1 * jax.random.normal(ks[10], (Cout, Cin, 1, 1), jnp.float32),  # skip w
        jnp.ones((Cout,), jnp.float32),                                   # skip gamma
        jnp.zeros((Cout,), jnp.float32),                                  # skip beta
        jnp.zeros((Cout,), jnp.float32),                                  # skip mean
        jnp.ones((Cout,), jnp.float32),                                   # skip var
    )

    x = jax.random.normal(ks[11], (N, Cin, H, W), jnp.float32)

    # block_n=1 keeps grid=(2,), one parallel step per v7x TensorCore.
    out = jax.block_until_ready(residual_forward(x, params))
    ref = jax.block_until_ready(_reference_forward(x, params))

    assert out.shape == (N, Cout, H, W)
    assert jnp.max(jnp.abs(out - ref)) < 2e-3, "mismatch vs JAX reference"
    print("KERNEL_OK")
</pallas_src>

<mosaic_0001>
module attributes {stable_mosaic.version = 11 : i64} {
  func.func @_residual_kernel(%arg0: i32, %arg1: memref<1x16x64xf32, #tpu.memory_space<vmem>>, %arg2: memref<3x64x128xf32, #tpu.memory_space<vmem>>, %arg3: memref<1x128xf32, #tpu.memory_space<vmem>>, %arg4: memref<1x128xf32, #tpu.memory_space<vmem>>, %arg5: memref<3x128x128xf32, #tpu.memory_space<vmem>>, %arg6: memref<1x128xf32, #tpu.memory_space<vmem>>, %arg7: memref<1x128xf32, #tpu.memory_space<vmem>>, %arg8: memref<64x128xf32, #tpu.memory_space<vmem>>, %arg9: memref<1x128xf32, #tpu.memory_space<vmem>>, %arg10: memref<1x128xf32, #tpu.memory_space<vmem>>, %arg11: memref<1x16x128xf32, #tpu.memory_space<vmem>>, %arg12: memref<18x64xf32, #tpu.memory_space<vmem>>, %arg13: memref<18x128xf32, #tpu.memory_space<vmem>>) attributes {dimension_semantics = [#tpu.dimension_semantics<parallel>], iteration_bounds = array<i64: 2>, scalar_prefetch = 0 : i64, scratch_operands = 2 : i64, tpu.core_type = #tpu.core_type<tc>, window_params = [{transform_indices = @transform_0, window_bounds = array<i64: 1, 16, 64>}, {pipeline_mode = #tpu.pipeline_mode<synchronous>, transform_indices = @transform_1, window_bounds = array<i64: 3, 64, 128>}, {pipeline_mode = #tpu.pipeline_mode<synchronous>, transform_indices = @transform_2, window_bounds = array<i64: 1, 128>}, {pipeline_mode = #tpu.pipeline_mode<synchronous>, transform_indices = @transform_3, window_bounds = array<i64: 1, 128>}, {pipeline_mode = #tpu.pipeline_mode<synchronous>, transform_indices = @transform_4, window_bounds = array<i64: 3, 128, 128>}, {pipeline_mode = #tpu.pipeline_mode<synchronous>, transform_indices = @transform_5, window_bounds = array<i64: 1, 128>}, {pipeline_mode = #tpu.pipeline_mode<synchronous>, transform_indices = @transform_6, window_bounds = array<i64: 1, 128>}, {pipeline_mode = #tpu.pipeline_mode<synchronous>, transform_indices = @transform_7, window_bounds = array<i64: 64, 128>}, {pipeline_mode = #tpu.pipeline_mode<synchronous>, transform_indices = @transform_8, window_bounds = array<i64: 1, 128>}, {pipeline_mode = #tpu.pipeline_mode<synchronous>, transform_indices = @transform_9, window_bounds = array<i64: 1, 128>}, {transform_indices = @transform_10, window_bounds = array<i64: 1, 16, 128>}]} {
    %c0 = arith.constant 0 : index
    %c0_0 = arith.constant 0 : index
    %0 = vector.load %arg3[%c0, %c0_0] : memref<1x128xf32, #tpu.memory_space<vmem>>, vector<1x128xf32>
    %c0_1 = arith.constant 0 : index
    %c0_2 = arith.constant 0 : index
    %1 = vector.load %arg4[%c0_1, %c0_2] : memref<1x128xf32, #tpu.memory_space<vmem>>, vector<1x128xf32>
    %c0_3 = arith.constant 0 : index
    %c0_4 = arith.constant 0 : index
    %2 = vector.load %arg6[%c0_3, %c0_4] : memref<1x128xf32, #tpu.memory_space<vmem>>, vector<1x128xf32>
    %c0_5 = arith.constant 0 : index
    %c0_6 = arith.constant 0 : index
    %3 = vector.load %arg7[%c0_5, %c0_6] : memref<1x128xf32, #tpu.memory_space<vmem>>, vector<1x128xf32>
    %c0_7 = arith.constant 0 : index
    %c0_8 = arith.constant 0 : index
    %4 = vector.load %arg9[%c0_7, %c0_8] : memref<1x128xf32, #tpu.memory_space<vmem>>, vector<1x128xf32>
    %c0_9 = arith.constant 0 : index
    %c0_10 = arith.constant 0 : index
    %5 = vector.load %arg10[%c0_9, %c0_10] : memref<1x128xf32, #tpu.memory_space<vmem>>, vector<1x128xf32>
    %cst = arith.constant 0.000000e+00 : f32
    %6 = vector.broadcast %cst : f32 to vector<1x64xf32>
    %c0_11 = arith.constant 0 : index
    %c0_12 = arith.constant 0 : index
    %7 = vector.load %arg12[%c0_11, %c0_12] : memref<18x64xf32, #tpu.memory_space<vmem>>, vector<1x64xf32>
    tpu.vector_store %arg12[%c0_11, %c0_12], %6 {strides = array<i32>} : memref<18x64xf32, #tpu.memory_space<vmem>>, vector<1x64xf32>,
    %cst_13 = arith.constant 0.000000e+00 : f32
    %8 = vector.broadcast %cst_13 : f32 to vector<1x64xf32>
    %c17 = arith.constant 17 : index
    %c0_14 = arith.constant 0 : index
    %9 = vector.load %arg12[%c17, %c0_14] : memref<18x64xf32, #tpu.memory_space<vmem>>, vector<1x64xf32>
    tpu.vector_store %arg12[%c17, %c0_14], %8 {strides = array<i32>} : memref<18x64xf32, #tpu.memory_space<vmem>>, vector<1x64xf32>,
    %cst_15 = arith.constant 0.000000e+00 : f32
    %10 = vector.broadcast %cst_15 : f32 to vector<1x128xf32>
    %c0_16 = arith.constant 0 : index
    %c0_17 = arith.constant 0 : index
    %11 = vector.load %arg13[%c0_16, %c0_17] : memref<18x128xf32, #tpu.memory_space<vmem>>, vector<1x128xf32>
    tpu.vector_store %arg13[%c0_16, %c0_17], %10 {strides = array<i32>} : memref<18x128xf32, #tpu.memory_space<vmem>>, vector<1x128xf32>,
    %cst_18 = arith.constant 0.000000e+00 : f32
    %12 = vector.broadcast %cst_18 : f32 to vector<1x128xf32>
    %c17_19 = arith.constant 17 : index
    %c0_20 = arith.constant 0 : index
    %13 = vector.load %arg13[%c17_19, %c0_20] : memref<18x128xf32, #tpu.memory_space<vmem>>, vector<1x128xf32>
    tpu.vector_store %arg13[%c17_19, %c0_20], %12 {strides = array<i32>} : memref<18x128xf32, #tpu.memory_space<vmem>>, vector<1x128xf32>,
    %c0_21 = arith.constant 0 : index
    %c0_22 = arith.constant 0 : index
    %c0_23 = arith.constant 0 : index
    %14 = vector.load %arg1[%c0_21, %c0_22, %c0_23] : memref<1x16x64xf32, #tpu.memory_space<vmem>>, vector<1x16x64xf32>
    %15 = vector.shape_cast %14 : vector<1x16x64xf32> to vector<16x64xf32>
    %c1 = arith.constant 1 : index
    %c0_24 = arith.constant 0 : index
    %16 = vector.load %arg12[%c1, %c0_24] : memref<18x64xf32, #tpu.memory_space<vmem>>, vector<16x64xf32>
    tpu.vector_store %arg12[%c1, %c0_24], %15 {strides = array<i32>} : memref<18x64xf32, #tpu.memory_space<vmem>>, vector<16x64xf32>,
    %cst_25 = arith.constant 0.000000e+00 : f32
    %17 = vector.broadcast %cst_25 : f32 to vector<16x128xf32>
    %c0_26 = arith.constant 0 : index
    %c0_27 = arith.constant 0 : index
    %18 = vector.load %arg12[%c0_26, %c0_27] : memref<18x64xf32, #tpu.memory_space<vmem>>, vector<16x64xf32>
    %c0_28 = arith.constant 0 : index
    %c0_29 = arith.constant 0 : index
    %c0_30 = arith.constant 0 : index
    %19 = vector.load %arg2[%c0_28, %c0_29, %c0_30] : memref<3x64x128xf32, #tpu.memory_space<vmem>>, vector<1x64x128xf32>
    %20 = vector.shape_cast %19 : vector<1x64x128xf32> to vector<64x128xf32>
    %cst_31 = arith.constant dense<0.000000e+00> : vector<16x128xf32>
    %21 = tpu.matmul %18, %20, %cst_31 {dimension_numbers = #tpu.dot_dimension_numbers<[1], [0], [0], [1], [0, 0, 1, 1], [], []>} : vector<16x64xf32>, vector<64x128xf32>, vector<16x128xf32> -> vector<16x128xf32>
    %22 = arith.addf %17, %21 : vector<16x128xf32>
    %c1_32 = arith.constant 1 : index
    %c0_33 = arith.constant 0 : index
    %23 = vector.load %arg12[%c1_32, %c0_33] : memref<18x64xf32, #tpu.memory_space<vmem>>, vector<16x64xf32>
    %c1_34 = arith.constant 1 : index
    %c0_35 = arith.constant 0 : index
    %c0_36 = arith.constant 0 : index
    %24 = vector.load %arg2[%c1_34, %c0_35, %c0_36] : memref<3x64x128xf32, #tpu.memory_space<vmem>>, vector<1x64x128xf32>
    %25 = vector.shape_cast %24 : vector<1x64x128xf32> to vector<64x128xf32>
    %cst_37 = arith.constant dense<0.000000e+00> : vector<16x128xf32>
    %26 = tpu.matmul %23, %25, %cst_37 {dimension_numbers = #tpu.dot_dimension_numbers<[1], [0], [0], [1], [0, 0, 1, 1], [], []>} : vector<16x64xf32>, vector<64x128xf32>, vector<16x128xf32> -> vector<16x128xf32>
    %27 = arith.addf %22, %26 : vector<16x128xf32>
    %c2 = arith.constant 2 : index
    %c0_38 = arith.constant 0 : index
    %28 = vector.load %arg12[%c2, %c0_38] : memref<18x64xf32, #tpu.memory_space<vmem>>, vector<16x64xf32>
    %c2_39 = arith.constant 2 : index
    %c0_40 = arith.constant 0 : index
    %c0_41 = arith.constant 0 : index
    %29 = vector.load %arg2[%c2_39, %c0_40, %c0_41] : memref<3x64x128xf32, #tpu.memory_space<vmem>>, vector<1x64x128xf32>
    %30 = vector.shape_cast %29 : vector<1x64x128xf32> to vector<64x128xf32>
    %cst_42 = arith.constant dense<0.000000e+00> : vector<16x128xf32>
    %31 = tpu.matmul %28, %30, %cst_42 {dimension_numbers = #tpu.dot_dimension_numbers<[1], [0], [0], [1], [0, 0, 1, 1], [], []>} : vector<16x64xf32>, vector<64x128xf32>, vector<16x128xf32> -> vector<16x128xf32>
    %32 = arith.addf %27, %31 : vector<16x128xf32>
    %33 = vector.broadcast %0 : vector<1x128xf32> to vector<16x128xf32>
    %34 = arith.mulf %32, %33 : vector<16x128xf32>
    %35 = vector.broadcast %1 : vector<1x128xf32> to vector<16x128xf32>
    %36 = arith.addf %34, %35 : vector<16x128xf32>
    %cst_43 = arith.constant 0.000000e+00 : f32
    %37 = vector.broadcast %cst_43 : f32 to vector<16x128xf32>
    %38 = arith.maximumf %36, %37 : vector<16x128xf32>
    %c1_44 = arith.constant 1 : index
    %c0_45 = arith.constant 0 : index
    %39 = vector.load %arg13[%c1_44, %c0_45] : memref<18x128xf32, #tpu.memory_space<vmem>>, vector<16x128xf32>
    tpu.vector_store %arg13[%c1_44, %c0_45], %38 {strides = array<i32>} : memref<18x128xf32, #tpu.memory_space<vmem>>, vector<16x128xf32>,
    %cst_46 = arith.constant 0.000000e+00 : f32
    %40 = vector.broadcast %cst_46 : f32 to vector<16x128xf32>
    %c0_47 = arith.constant 0 : index
    %c0_48 = arith.constant 0 : index
    %41 = vector.load %arg13[%c0_47, %c0_48] : memref<18x128xf32, #tpu.memory_space<vmem>>, vector<16x128xf32>
    %c0_49 = arith.constant 0 : index
    %c0_50 = arith.constant 0 : index
    %c0_51 = arith.constant 0 : index
    %42 = vector.load %arg5[%c0_49, %c0_50, %c0_51] : memref<3x128x128xf32, #tpu.memory_space<vmem>>, vector<1x128x128xf32>
    %43 = vector.shape_cast %42 : vector<1x128x128xf32> to vector<128x128xf32>
    %cst_52 = arith.constant dense<0.000000e+00> : vector<16x128xf32>
    %44 = tpu.matmul %41, %43, %cst_52 {dimension_numbers = #tpu.dot_dimension_numbers<[1], [0], [0], [1], [0, 0, 1, 1], [], []>} : vector<16x128xf32>, vector<128x128xf32>, vector<16x128xf32> -> vector<16x128xf32>
    %45 = arith.addf %40, %44 : vector<16x128xf32>
    %c1_53 = arith.constant 1 : index
    %c0_54 = arith.constant 0 : index
    %46 = vector.load %arg13[%c1_53, %c0_54] : memref<18x128xf32, #tpu.memory_space<vmem>>, vector<16x128xf32>
    %c1_55 = arith.constant 1 : index
    %c0_56 = arith.constant 0 : index
    %c0_57 = arith.constant 0 : index
    %47 = vector.load %arg5[%c1_55, %c0_56, %c0_57] : memref<3x128x128xf32, #tpu.memory_space<vmem>>, vector<1x128x128xf32>
    %48 = vector.shape_cast %47 : vector<1x128x128xf32> to vector<128x128xf32>
    %cst_58 = arith.constant dense<0.000000e+00> : vector<16x128xf32>
    %49 = tpu.matmul %46, %48, %cst_58 {dimension_numbers = #tpu.dot_dimension_numbers<[1], [0], [0], [1], [0, 0, 1, 1], [], []>} : vector<16x128xf32>, vector<128x128xf32>, vector<16x128xf32> -> vector<16x128xf32>
    %50 = arith.addf %45, %49 : vector<16x128xf32>
    %c2_59 = arith.constant 2 : index
    %c0_60 = arith.constant 0 : index
    %51 = vector.load %arg13[%c2_59, %c0_60] : memref<18x128xf32, #tpu.memory_space<vmem>>, vector<16x128xf32>
    %c2_61 = arith.constant 2 : index
    %c0_62 = arith.constant 0 : index
    %c0_63 = arith.constant 0 : index
    %52 = vector.load %arg5[%c2_61, %c0_62, %c0_63] : memref<3x128x128xf32, #tpu.memory_space<vmem>>, vector<1x128x128xf32>
    %53 = vector.shape_cast %52 : vector<1x128x128xf32> to vector<128x128xf32>
    %cst_64 = arith.constant dense<0.000000e+00> : vector<16x128xf32>
    %54 = tpu.matmul %51, %53, %cst_64 {dimension_numbers = #tpu.dot_dimension_numbers<[1], [0], [0], [1], [0, 0, 1, 1], [], []>} : vector<16x128xf32>, vector<128x128xf32>, vector<16x128xf32> -> vector<16x128xf32>
    %55 = arith.addf %50, %54 : vector<16x128xf32>
    %56 = vector.broadcast %2 : vector<1x128xf32> to vector<16x128xf32>
    %57 = arith.mulf %55, %56 : vector<16x128xf32>
    %58 = vector.broadcast %3 : vector<1x128xf32> to vector<16x128xf32>
    %59 = arith.addf %57, %58 : vector<16x128xf32>
    %c0_65 = arith.constant 0 : index
    %c0_66 = arith.constant 0 : index
    %60 = vector.load %arg8[%c0_65, %c0_66] : memref<64x128xf32, #tpu.memory_space<vmem>>, vector<64x128xf32>
    %cst_67 = arith.constant dense<0.000000e+00> : vector<16x128xf32>
    %61 = tpu.matmul %15, %60, %cst_67 {dimension_numbers = #tpu.dot_dimension_numbers<[1], [0], [0], [1], [0, 0, 1, 1], [], []>} : vector<16x64xf32>, vector<64x128xf32>, vector<16x128xf32> -> vector<16x128xf32>
    %62 = vector.broadcast %4 : vector<1x128xf32> to vector<16x128xf32>
    %63 = arith.mulf %61, %62 : vector<16x128xf32>
    %64 = vector.broadcast %5 : vector<1x128xf32> to vector<16x128xf32>
    %65 = arith.addf %63, %64 : vector<16x128xf32>
    %66 = arith.addf %59, %65 : vector<16x128xf32>
    %cst_68 = arith.constant 0.000000e+00 : f32
    %67 = vector.broadcast %cst_68 : f32 to vector<16x128xf32>
    %68 = arith.maximumf %66, %67 : vector<16x128xf32>
    %c0_69 = arith.constant 0 : index
    %c0_70 = arith.constant 0 : index
    %c0_71 = arith.constant 0 : index
    %69 = vector.load %arg11[%c0_69, %c0_70, %c0_71] : memref<1x16x128xf32, #tpu.memory_space<vmem>>, vector<1x16x128xf32>
    %70 = vector.shape_cast %69 : vector<1x16x128xf32> to vector<16x128xf32>
    %71 = vector.shape_cast %68 : vector<16x128xf32> to vector<1x16x128xf32>
    tpu.vector_store %arg11[%c0_69, %c0_70, %c0_71], %71 {strides = array<i32>} : memref<1x16x128xf32, #tpu.memory_space<vmem>>, vector<1x16x128xf32>,
    return
  }
  func.func @transform_0(%arg0: i32) -> (i32, i32, i32) {
    %c0_i32 = arith.constant 0 : i32
    %c0_i32_0 = arith.constant 0 : i32
    %c0_i32_1 = arith.constant 0 : i32
    return %arg0, %c0_i32, %c0_i32_0 : i32, i32, i32
  }
  func.func @transform_1(%arg0: i32) -> (i32, i32, i32) {
    %c0_i32 = arith.constant 0 : i32
    %c0_i32_0 = arith.constant 0 : i32
    %c0_i32_1 = arith.constant 0 : i32
    %c0_i32_2 = arith.constant 0 : i32
    return %c0_i32, %c0_i32_0, %c0_i32_1 : i32, i32, i32
  }
  func.func @transform_2(%arg0: i32) -> (i32, i32) {
    %c0_i32 = arith.constant 0 : i32
    %c0_i32_0 = arith.constant 0 : i32
    %c0_i32_1 = arith.constant 0 : i32
    return %c0_i32, %c0_i32_0 : i32, i32
  }
  func.func @transform_3(%arg0: i32) -> (i32, i32) {
    %c0_i32 = arith.constant 0 : i32
    %c0_i32_0 = arith.constant 0 : i32
    %c0_i32_1 = arith.constant 0 : i32
    return %c0_i32, %c0_i32_0 : i32, i32
  }
  func.func @transform_4(%arg0: i32) -> (i32, i32, i32) {
    %c0_i32 = arith.constant 0 : i32
    %c0_i32_0 = arith.constant 0 : i32
    %c0_i32_1 = arith.constant 0 : i32
    %c0_i32_2 = arith.constant 0 : i32
    return %c0_i32, %c0_i32_0, %c0_i32_1 : i32, i32, i32
  }
  func.func @transform_5(%arg0: i32) -> (i32, i32) {
    %c0_i32 = arith.constant 0 : i32
    %c0_i32_0 = arith.constant 0 : i32
    %c0_i32_1 = arith.constant 0 : i32
    return %c0_i32, %c0_i32_0 : i32, i32
  }
  func.func @transform_6(%arg0: i32) -> (i32, i32) {
    %c0_i32 = arith.constant 0 : i32
    %c0_i32_0 = arith.constant 0 : i32
    %c0_i32_1 = arith.constant 0 : i32
    return %c0_i32, %c0_i32_0 : i32, i32
  }
  func.func @transform_7(%arg0: i32) -> (i32, i32) {
    %c0_i32 = arith.constant 0 : i32
    %c0_i32_0 = arith.constant 0 : i32
    %c0_i32_1 = arith.constant 0 : i32
    return %c0_i32, %c0_i32_0 : i32, i32
  }
  func.func @transform_8(%arg0: i32) -> (i32, i32) {
    %c0_i32 = arith.constant 0 : i32
    %c0_i32_0 = arith.constant 0 : i32
    %c0_i32_1 = arith.constant 0 : i32
    return %c0_i32, %c0_i32_0 : i32, i32
  }
  func.func @transform_9(%arg0: i32) -> (i32, i32) {
    %c0_i32 = arith.constant 0 : i32
    %c0_i32_0 = arith.constant 0 : i32
    %c0_i32_1 = arith.constant 0 : i32
    return %c0_i32, %c0_i32_0 : i32, i32
  }
  func.func @transform_10(%arg0: i32) -> (i32, i32, i32) {
    %c0_i32 = arith.constant 0 : i32
    %c0_i32_0 = arith.constant 0 : i32
    %c0_i32_1 = arith.constant 0 : i32
    return %arg0, %c0_i32, %c0_i32_0 : i32, i32, i32
  }
}

</mosaic_0001>

<bundles_post_ra>
// kernel: tile.33
= control target key start
LH: loop header
LB: loop body
LE: loop exit
PB: predicated region body
PF: predicated region fallthrough
CT: control target
= control target key end

     0   :  { %s28_s0 = inlined_call_operand.vmem [shape: f32[8], index: 0, kind: input, shape index: {}]   ;;  %s29_s1 = inlined_call_operand.vmem [shape: f32[16,8], index: 1, kind: output, shape index: {}]  }
   0x1   :  { %v4_v0 = vld [vmem:[%s28_s0] ss:$0 sm:$0xff] }
   0x2   :  { %5 = vst [vmem:[%s29_s1] sm:$0xff] %v4_v0  ;;  %8 = vst [vmem:[%s29_s1 + $0x8] sm:$0xff] %v4_v0 }

// kernel: tile.34
= control target key start
LH: loop header
LB: loop body
LE: loop exit
PB: predicated region body
PF: predicated region fallthrough
CT: control target
= control target key end

     0   :  { %s133_s10 = smov 120   ;;  %s134_s11 = smov 104   ;;  %vm3_vm0 = vcmask 64512   ;;  %vm9_vm1 = vcmask 1048512   ;;  %vm15_vm2 = vcmask 982912   ;;  %vm21_vm3 = vcmask 917312   ;;  %s209_s0 = inlined_call_operand.vmem [shape: f32[16,8], index: 0, kind: input, shape index: {}]   ;;  %s210_s1 = inlined_call_operand.vmem [shape: f32[1,128], index: 1, kind: output, shape index: {}]  }
   0x1   :  { %v103_v0 = vld [vmem:[%s209_s0 + $0xf] sm:$0x1]   ;;  %v105_v1 = vld [vmem:[%s209_s0 + $0xd] sm:$0x1]   ;;  %v104_v2 = vld [vmem:[%s209_s0 + $0xe] sm:$0x1]  }
   0x2   :  { %7 = vrot.lane.b32.xlu0 %v103_v0, %s133_s10  ;;  %19 = vrot.lane.b32.xlu1 %v105_v1, %s134_s11  ;;  %v106_v3 = vld [vmem:[%s209_s0 + $0xc] sm:$0x1]   ;;  %s135_s16 = smov 112   ;;  %s136_s17 = smov 96   ;;  %v107_v4 = vld [vmem:[%s209_s0 + $0xb] sm:$0x1]  }
   0x3   :  { %v108_v5 = vld [vmem:[%s209_s0 + $0xa] sm:$0x1]   ;;  %v2_v6 = vld [vmem:[%s209_s0] sm:$0x1]   ;;  %s137_s24 = smov 88   ;;  %s138_s25 = smov 80  }
   0x4   :  { %4 = vst.msk [vmem:[#allocation0] sm:$0x1] %vm3_vm0, %v2_v6   ;;  %v109_v7 = vld [vmem:[%s209_s0 + $0x9] sm:$0x1]   ;;  %v110_v8 = vld [vmem:[%s209_s0 + $0x8] sm:$0x1]  }
   0x5   :  { %s139_s30 = smov 72   ;;  %s140_s2 = smov 64   ;;  %v111_v9 = vld [vmem:[%s209_s0 + $0x7] sm:$0x1]   ;;  %v112_v10 = vld [vmem:[%s209_s0 + $0x6] sm:$0x1]  }
   0x6   :  { %13 = vrot.lane.b32.xlu0 %v104_v2, %s135_s16  ;;  %25 = vrot.lane.b32.xlu1 %v106_v3, %s136_s17  ;;  %s141_s7 = smov 56   ;;  %s142_s8 = smov 48   ;;  %v113_v11 = vld [vmem:[%s209_s0 + $0x5] sm:$0x1]   ;;  %v114_v12 = vld [vmem:[%s209_s0 + $0x4] sm:$0x1]  }
   0x7   :  { %s143_s13 = smov 40   ;;  %s144_s14 = smov 32   ;;  %v115_v13 = vld [vmem:[%s209_s0 + $0x3] sm:$0x1]   ;;  %v116_v14 = vld [vmem:[%s209_s0 + $0x2] sm:$0x1]  }
   0x8   :  { %s145_s19 = smov 24   ;;  %s146_s20 = smov 16   ;;  %v117_v15 = vld [vmem:[%s209_s0 + $0x1] sm:$0x1]   ;;  %vm27_vm4 = vcmask 851712   ;;  %vm33_vm5 = vcmask 786112  }
   0x9   :  { %s147_s0 = smov 8   ;;  %vm39_vm6 = vcmask 720512   ;;  %vm45_vm7 = vcmask 654912   ;;  %vm51_vm8 = vcmask 589312   ;;  %vm57_vm9 = vcmask 523712  }
   0xa   :  { %31 = vrot.lane.b32.xlu0 %v107_v4, %s137_s24  ;;  %37 = vrot.lane.b32.xlu1 %v108_v5, %s138_s25  ;;  %vm63_vm10 = vcmask 458112   ;;  %vm69_vm11 = vcmask 392512   ;;  %vm75_vm12 = vcmask 326912   ;;  %vm81_vm13 = vcmask 261312  }
   0xb   :  { %vm87_vm14 = vcmask 195712   ;;  %vm93_vm15 = vcmask 130112  }
   0xe   :  { %43 = vrot.lane.b32.xlu0 %v109_v7, %s139_s30  ;;  %49 = vrot.lane.b32.xlu1 %v110_v8, %s140_s2 }
  0x12   :  { %55 = vrot.lane.b32.xlu0 %v111_v9, %s141_s7  ;;  %61 = vrot.lane.b32.xlu1 %v112_v10, %s142_s8 }
  0x16   :  { %67 = vrot.lane.b32.xlu0 %v113_v11, %s143_s13  ;;  %73 = vrot.lane.b32.xlu1 %v114_v12, %s144_s14 }
  0x1a   :  { %79 = vrot.lane.b32.xlu0 %v115_v13, %s145_s19  ;;  %85 = vrot.lane.b32.xlu1 %v116_v14, %s146_s20 }
  0x1e   :  { %91 = vrot.lane.b32.xlu0 %v117_v15, %s147_s0 }
  0x74   :  { %v8_v16 = vpop.permute.xlu0 %7   ;;  %v20_v17 = vpop.permute.xlu1 %19  }
  0x75   :  { %10 = vst.msk [vmem:[#allocation0] sm:$0x1] %vm9_vm1, %v8_v16  }
  0x78   :  { %v14_v18 = vpop.permute.xlu0 %13   ;;  %v26_v19 = vpop.permute.xlu1 %25  }
  0x79   :  { %16 = vst.msk [vmem:[#allocation0] sm:$0x1] %vm15_vm2, %v14_v18  }
  0x7a   :  { %22 = vst.msk [vmem:[#allocation0] sm:$0x1] %vm21_vm3, %v20_v17  }
  0x7b   :  { %28 = vst.msk [vmem:[#allocation0] sm:$0x1] %vm27_vm4, %v26_v19  }
  0x7c   :  { %v32_v20 = vpop.permute.xlu0 %31   ;;  %v38_v21 = vpop.permute.xlu1 %37  }
  0x7d   :  { %34 = vst.msk [vmem:[#allocation0] sm:$0x1] %vm33_vm5, %v32_v20  }
  0x7e   :  { %40 = vst.msk [vmem:[#allocation0] sm:$0x1] %vm39_vm6, %v38_v21  }
  0x80   :  { %v44_v22 = vpop.permute.xlu0 %43   ;;  %v50_v23 = vpop.permute.xlu1 %49  }
  0x81   :  { %46 = vst.msk [vmem:[#allocation0] sm:$0x1] %vm45_vm7, %v44_v22  }
  0x82   :  { %52 = vst.msk [vmem:[#allocation0] sm:$0x1] %vm51_vm8, %v50_v23  }
  0x84   :  { %v56_v24 = vpop.permute.xlu0 %55   ;;  %v62_v25 = vpop.permute.xlu1 %61  }
  0x85   :  { %58 = vst.msk [vmem:[#allocation0] sm:$0x1] %vm57_vm9, %v56_v24  }
  0x86   :  { %64 = vst.msk [vmem:[#allocation0] sm:$0x1] %vm63_vm10, %v62_v25  }
  0x88   :  { %v68_v26 = vpop.permute.xlu0 %67   ;;  %v74_v27 = vpop.permute.xlu1 %73  }
  0x89   :  { %70 = vst.msk [vmem:[#allocation0] sm:$0x1] %vm69_vm11, %v68_v26  }
  0x8a   :  { %76 = vst.msk [vmem:[#allocation0] sm:$0x1] %vm75_vm12, %v74_v27  }
  0x8c   :  { %v80_v28 = vpop.permute.xlu0 %79   ;;  %v86_v29 = vpop.permute.xlu1 %85  }
  0x8d   :  { %82 = vst.msk [vmem:[#allocation0] sm:$0x1] %vm81_vm13, %v80_v28  }
  0x8e   :  { %88 = vst.msk [vmem:[#allocation0] sm:$0x1] %vm87_vm14, %v86_v29  }
  0x90   :  { %v92_v30 = vpop.permute.xlu0 %91  }
  0x91   :  { %94 = vst.msk [vmem:[#allocation0] sm:$0x1] %vm93_vm15, %v92_v30  }
  0x98   :  { %v99_v31 = vld [vmem:[#allocation0] sm:$0x1] }
  0x99   :  { %102 = vst [vmem:[%s210_s1] sm:$0x1] %v99_v31 }

// kernel: residual_forward.1
= control target key start
LH: loop header
LB: loop body
LE: loop exit
PB: predicated region body
PF: predicated region fallthrough
CT: control target
= control target key end

     0   :  { %s1561_s13 = smov 0   ;;  %s1861_s0 = inlined_call_operand.vmem [shape: f32[2,16,64], index: 0, kind: input, shape index: {}]   ;;  %s1862_s1 = inlined_call_operand.vmem [shape: f32[3,64,128], index: 1, kind: input, shape index: {}]   ;;  %s1863_s2 = inlined_call_operand.vmem [shape: f32[1,128], index: 2, kind: input, shape index: {}]   ;;  %s1864_s3 = inlined_call_operand.vmem [shape: f32[1,128], index: 3, kind: input, shape index: {}]   ;;  %s1865_s4 = inlined_call_operand.vmem [shape: f32[3,128,128], index: 4, kind: input, shape index: {}]   ;;  %s1866_s5 = inlined_call_operand.vmem [shape: f32[1,128], index: 5, kind: input, shape index: {}]   ;;  %s1867_s6 = inlined_call_operand.vmem [shape: f32[1,128], index: 6, kind: input, shape index: {}]   ;;  %s1868_s7 = inlined_call_operand.vmem [shape: f32[64,128], index: 7, kind: input, shape index: {}]   ;;  %s1869_s8 = inlined_call_operand.vmem [shape: f32[1,128], index: 8, kind: input, shape index: {}]   ;;  %s1870_s9 = inlined_call_operand.vmem [shape: f32[1,128], index: 9, kind: input, shape index: {}]   ;;  %s1871_s10 = inlined_call_operand.vmem [shape: f32[2,16,128], index: 10, kind: output, shape index: {}]  }
   0x1 LB: > { %s1138_s14 = sadd.s32 4294967295, %s1503_s13   ;;  %p1142_p0 = scmp.ge.s32.totalorder %s1503_s13, 1  ;;  %s1503_s13 = sphi %s1561_s13, %s20_s13  }
   0x2   : > { %p312_p1 = scmp.lt.s32.totalorder %s1503_s13, 3 }
   0x4   : > { %p313_p2 = pnand %p1142_p0, %p312_p1 }
   0x5   : > { %p350_p3 = scmp.lt.s32.totalorder (!%p313_p2), %s1138_s14, 1 }
   0x6   : > { %316 = sbr.rel (%p313_p2) target bundleno = 489 (0x1e9), region = 60 }
   0xb   : > { %v1154_v0 = vld [vmem:[%s1862_s1 + $0x78] sm:$0xff]  ;;  %v1153_v2 = vld [vmem:[%s1862_s1 + $0x70] sm:$0xff]  ;;  %vm366_vm0 = vcmask 516096   ;;  %v1152_v4 = vld [vmem:[%s1862_s1 + $0x68] sm:$0xff]  ;;  %s1873_s14 = smov (!%p350_p3, %s1138_s14), 1  ;;  %v1505_v6 = vmov 0.0  }
   0xc   : > { %v385_v1 = vld [vmem:[%s1862_s1 + $0x38] sm:$0xff]  ;;  %1307 = vmatprep.subr.mxu0 %v1154_v0  ;;  %v384_v3 = vld [vmem:[%s1862_s1 + $0x30] sm:$0xff]  ;;  %v383_v5 = vld [vmem:[%s1862_s1 + $0x28] sm:$0xff]  ;;  %367 = vst.msk [vmem:[#allocation2] sm:$0x1] %vm366_vm0, %v1505_v6  ;;  %s1211_s11 = sshll.u32 %s1873_s14, 4 }
   0xd   : > { %1326 = vmatprep.subr.mxu1 %v385_v1  ;;  %1308 = vmatpush3.msra.mxu0 %v1154_v0  ;;  %368 = vst.msk [vmem:[#allocation2 + $0x11] sm:$0x1] %vm366_vm0, %v1505_v6  ;;  %369 = vst [vmem:[#allocation3] sm:$0x1] %v1505_v6  ;;  %v1151_v7 = vld [vmem:[%s1862_s1 + $0x60] sm:$0xff]  ;;  %vm373_vm1 = vcmask 523264   ;;  %s354_s18 = scalar_lea.vmem %s1861_s0, %s1211_s11  ;;  %s359_s22 = scalar_lea.vmem %s1871_s10, %s1211_s11 }
   0xe   : > { %1327 = vmatpush3.msra.mxu1 %v385_v1  ;;  %370 = vst [vmem:[#allocation3 + $0x11] sm:$0x1] %v1505_v6  ;;  %1309 = vmatprep.subr.mxu0 %v1153_v2  ;;  %v382_v8 = vld [vmem:[%s1862_s1 + $0x20] sm:$0xff]  ;;  %v1150_v9 = vld [vmem:[%s1862_s1 + $0x58] sm:$0xff]  ;;  %v1609_v12 = vld [vmem:[%s354_s18 + $0x8] sm:$0xff] }
   0xf   : > { %1328 = vmatprep.subr.mxu1 %v384_v3  ;;  %1310 = vmatpush3.msra.mxu0 %v1153_v2  ;;  %v381_v10 = vld [vmem:[%s1862_s1 + $0x18] sm:$0xff]  ;;  %v1607_v11 = vld [vmem:[%s354_s18] sm:$0xff]  ;;  %375 = vst.msk [vmem:[#allocation2 + $0x9] sm:$0xff] %vm373_vm1, %v1609_v12  ;;  %v1149_v13 = vld [vmem:[%s1862_s1 + $0x50] sm:$0xff] }
  0x10   : > { %1329 = vmatpush3.msra.mxu1 %v384_v3  ;;  %1311 = vmatprep.subr.mxu0 %v1152_v4  ;;  %374 = vst.msk [vmem:[#allocation2 + $0x1] sm:$0xff] %vm373_vm1, %v1607_v11  ;;  %v380_v14 = vld [vmem:[%s1862_s1 + $0x10] sm:$0xff]  ;;  %v1148_v15 = vld [vmem:[%s1862_s1 + $0x48] sm:$0xff]  ;;  %v1147_v17 = vld [vmem:[%s1862_s1 + $0x40] sm:$0xff] }
  0x11   : > { %1330 = vmatprep.subr.mxu1 %v383_v5  ;;  %1312 = vmatpush3.msra.mxu0 %v1152_v4  ;;  %v379_v16 = vld [vmem:[%s1862_s1 + $0x8] sm:$0xff]  ;;  %v378_v18 = vld [vmem:[%s1862_s1] sm:$0xff]  ;;  %v1166_v23 = vld [vmem:[%s1862_s1 + $0xb8] sm:$0xff] }
  0x12   : > { %1331 = vmatpush3.msra.mxu1 %v383_v5  ;;  %1313 = vmatprep.subr.mxu0 %v1151_v7  ;;  %v1165_v25 = vld [vmem:[%s1862_s1 + $0xb0] sm:$0xff]  ;;  %v1164_v26 = vld [vmem:[%s1862_s1 + $0xa8] sm:$0xff]  ;;  %v1163_v27 = vld [vmem:[%s1862_s1 + $0xa0] sm:$0xff] }
  0x13   : > { %1332 = vmatprep.subr.mxu1 %v382_v8  ;;  %1314 = vmatpush3.msra.mxu0 %v1151_v7  ;;  %v1162_v28 = vld [vmem:[%s1862_s1 + $0x98] sm:$0xff]  ;;  %v1161_v29 = vld [vmem:[%s1862_s1 + $0x90] sm:$0xff]  ;;  %v1160_v30 = vld [vmem:[%s1862_s1 + $0x88] sm:$0xff] }
  0x14   : > { %1333 = vmatpush3.msra.mxu1 %v382_v8  ;;  %1315 = vmatprep.subr.mxu0 %v1150_v9  ;;  %v1159_v31 = vld [vmem:[%s1862_s1 + $0x80] sm:$0xff]  ;;  %v1186_v33 = vld [vmem:[%s1865_s4 + $0xf8] sm:$0xff]  ;;  %v1185_v34 = vld [vmem:[%s1865_s4 + $0xf0] sm:$0xff] }
  0x15   : > { %1334 = vmatprep.subr.mxu1 %v381_v10  ;;  %1316 = vmatpush3.msra.mxu0 %v1150_v9  ;;  %v1184_v35 = vld [vmem:[%s1865_s4 + $0xe8] sm:$0xff]  ;;  %v1183_v36 = vld [vmem:[%s1865_s4 + $0xe0] sm:$0xff]  ;;  %v690_v37 = vld [vmem:[%s1865_s4 + $0x78] sm:$0xff] }
  0x16   : > { %1335 = vmatpush3.msra.mxu1 %v381_v10  ;;  %1317 = vmatprep.subr.mxu0 %v1149_v13  ;;  %v387_v21 = vld [vmem:[#allocation2 + $0x9] sm:$0xff]  ;;  %v1182_v39 = vld [vmem:[%s1865_s4 + $0xd8] sm:$0xff]  ;;  %v687_v43 = vld [vmem:[%s1865_s4 + $0x60] sm:$0xff] }
  0x17   : > { %1336 = vmatprep.subr.mxu1 %v380_v14  ;;  %1318 = vmatpush3.msra.mxu0 %v1149_v13  ;;  %v386_v19 = vld [vmem:[#allocation2 + $0x1] sm:$0xff]  ;;  %v560_v32 = vld [vmem:[#allocation2 + $0xa] sm:$0xff]  ;;  %v686_v44 = vld [vmem:[%s1865_s4 + $0x58] sm:$0xff] }
  0x18   : > { %1337 = vmatpush3.msra.mxu1 %v380_v14  ;;  %1319 = vmatprep.subr.mxu0 %v1148_v15  ;;  %v376_v20 = vld [vmem:[#allocation2] sm:$0xff]  ;;  %v377_v22 = vld [vmem:[#allocation2 + $0x8] sm:$0xff]  ;;  %v689_v38 = vld [vmem:[%s1865_s4 + $0x70] sm:$0xff] }
  0x19   : > { %1338 = vmatprep.subr.mxu1 %v379_v16  ;;  %1320 = vmatpush3.msra.mxu0 %v1148_v15  ;;  %v559_v24 = vld [vmem:[#allocation2 + $0x2] sm:$0xff]  ;;  %v1181_v41 = vld [vmem:[%s1865_s4 + $0xd0] sm:$0xff]  ;;  %v1178_v47 = vld [vmem:[%s1865_s4 + $0xb8] sm:$0xff] }
  0x1a   : > { %1339 = vmatpush3.msra.mxu1 %v379_v16  ;;  %1321 = vmatprep.subr.mxu0 %v1147_v17  ;;  %v688_v40 = vld [vmem:[%s1865_s4 + $0x68] sm:$0xff]  ;;  %v1179_v45 = vld [vmem:[%s1865_s4 + $0xc0] sm:$0xff]  ;;  %v685_v46 = vld [vmem:[%s1865_s4 + $0x50] sm:$0xff] }
  0x1b   : > { %1340 = vmatprep.subr.mxu1 %v378_v18  ;;  %1322 = vmatpush3.msra.mxu0 %v1147_v17  ;;  %v1180_v42 = vld [vmem:[%s1865_s4 + $0xc8] sm:$0xff]  ;;  %v1177_v48 = vld [vmem:[%s1865_s4 + $0xb0] sm:$0xff]  ;;  %v1175_v51 = vld [vmem:[%s1865_s4 + $0xa0] sm:$0xff] }
  0x1c   : > { %1323 = vmatprep.mubr.msk.f32.mxu0 %vm373_vm1, %v386_v19  ;;  %1341 = vmatpush3.msra.mxu1 %v378_v18  ;;  %v1176_v49 = vld [vmem:[%s1865_s4 + $0xa8] sm:$0xff]  ;;  %v683_v52 = vld [vmem:[%s1865_s4 + $0x40] sm:$0xff]  ;;  %v1174_v53 = vld [vmem:[%s1865_s4 + $0x98] sm:$0xff] }
  0x1d   : > { %1342 = vmatprep.mubr.msk.f32.mxu1 %vm373_vm1, %v376_v20  ;;  %1324 = vmatmul.mubr.msk.f32.vlgmr.msra.gmra.mxu0 %vm373_vm1, %v387_v21  ;;  %v684_v50 = vld [vmem:[%s1865_s4 + $0x48] sm:$0xff]  ;;  %v682_v54 = vld [vmem:[%s1865_s4 + $0x38] sm:$0xff]  ;;  %v1173_v55 = vld [vmem:[%s1865_s4 + $0x90] sm:$0xff] }
  0x1e   : > { %1343 = vmatmul.mubr.msk.f32.vlgmr.msra.gmra.mxu1 %vm373_vm1, %v377_v22  ;;  %1345 = vmatprep.subr.mxu0 %v1166_v23  ;;  %v681_v56 = vld [vmem:[%s1865_s4 + $0x30] sm:$0xff]  ;;  %v1172_v57 = vld [vmem:[%s1865_s4 + $0x88] sm:$0xff]  ;;  %v1171_v59 = vld [vmem:[%s1865_s4 + $0x80] sm:$0xff] }
  0x1f   : > { %1361 = vmatprep.mubr.msk.f32.mxu0 %vm373_vm1, %v559_v24  ;;  %1346 = vmatpush3.msra.mxu0 %v1166_v23  ;;  %v680_v58 = vld [vmem:[%s1865_s4 + $0x28] sm:$0xff]  ;;  %v679_v60 = vld [vmem:[%s1865_s4 + $0x20] sm:$0xff]  ;;  %v1202_v61 = vld [vmem:[%s1865_s4 + $0x178] sm:$0xff] }
  0x20   : > { %1347 = vmatprep.subr.mxu0 %v1165_v25  ;;  %1364 = vmatprep.subr.mxu1 %v1186_v33  ;;  %v678_v62 = vld [vmem:[%s1865_s4 + $0x18] sm:$0xff]  ;;  %v677_v63 = vld [vmem:[%s1865_s4 + $0x10] sm:$0xff]  ;;  %v676_v0 = vld [vmem:[%s1865_s4 + $0x8] sm:$0xff] }
  0x21   : > { %1348 = vmatpush3.msra.mxu0 %v1165_v25  ;;  %1365 = vmatpush3.msra.mxu1 %v1186_v33  ;;  %v675_v1 = vld [vmem:[%s1865_s4] sm:$0xff]  ;;  %v979_v2 = vld [vmem:[%s1868_s7 + $0x38] sm:$0xff]  ;;  %v1201_v23 = vld [vmem:[%s1865_s4 + $0x170] sm:$0xff] }
  0x22   : > { %1349 = vmatprep.subr.mxu0 %v1164_v26  ;;  %1366 = vmatprep.subr.mxu1 %v1185_v34  ;;  %v1169_v8 = vld [vmem:[%s1863_s2] ss:$0 sm:$0xff]  ;;  %v1200_v24 = vld [vmem:[%s1865_s4 + $0x168] sm:$0xff] }
  0x23   : > { %1350 = vmatpush3.msra.mxu0 %v1164_v26  ;;  %1367 = vmatpush3.msra.mxu1 %v1185_v34  ;;  %v1170_v14 = vld [vmem:[%s1864_s3] ss:$0 sm:$0xff]  ;;  %v1198_v26 = vld [vmem:[%s1865_s4 + $0x158] sm:$0xff]  ;;  %v1196_v33 = vld [vmem:[%s1865_s4 + $0x148] sm:$0xff] }
  0x24   : > { %1351 = vmatprep.subr.mxu0 %v1163_v27  ;;  %1368 = vmatprep.subr.mxu1 %v1184_v35  ;;  %v1199_v25 = vld [vmem:[%s1865_s4 + $0x160] sm:$0xff] }
  0x25   : > { %1352 = vmatpush3.msra.mxu0 %v1163_v27  ;;  %1369 = vmatpush3.msra.mxu1 %v1184_v35  ;;  %v976_v34 = vld [vmem:[%s1868_s7 + $0x20] sm:$0xff] }
  0x26   : > { %1353 = vmatprep.subr.mxu0 %v1162_v28  ;;  %1370 = vmatprep.subr.mxu1 %v1183_v36  ;;  %v1195_v35 = vld [vmem:[%s1865_s4 + $0x140] sm:$0xff] }
  0x27   : > { %1354 = vmatpush3.msra.mxu0 %v1162_v28  ;;  %1371 = vmatpush3.msra.mxu1 %v1183_v36  ;;  %v975_v36 = vld [vmem:[%s1868_s7 + $0x18] sm:$0xff] }
  0x28   : > { %1355 = vmatprep.subr.mxu0 %v1161_v29  ;;  %1372 = vmatprep.subr.mxu1 %v1182_v39 }
  0x29   : > { %1356 = vmatpush3.msra.mxu0 %v1161_v29  ;;  %1373 = vmatpush3.msra.mxu1 %v1182_v39  ;;  %v1193_v39 = vld [vmem:[%s1865_s4 + $0x130] sm:$0xff] }
  0x2a   : > { %1357 = vmatprep.subr.mxu0 %v1160_v30  ;;  %1374 = vmatprep.subr.mxu1 %v1181_v41 }
  0x2b   : > { %1358 = vmatpush3.msra.mxu0 %v1160_v30  ;;  %1375 = vmatpush3.msra.mxu1 %v1181_v41  ;;  %v978_v30 = vld [vmem:[%s1868_s7 + $0x30] sm:$0xff]  ;;  %v1192_v41 = vld [vmem:[%s1865_s4 + $0x128] sm:$0xff] }
  0x2c   : > { %1359 = vmatprep.subr.mxu0 %v1159_v31  ;;  %1376 = vmatprep.subr.mxu1 %v1180_v42 }
  0x2d   : > { %1360 = vmatpush3.msra.mxu0 %v1159_v31  ;;  %1377 = vmatpush3.msra.mxu1 %v1180_v42  ;;  %v1197_v31 = vld [vmem:[%s1865_s4 + $0x150] sm:$0xff]  ;;  %v972_v42 = vld [vmem:[%s1868_s7] sm:$0xff] }
  0x2e   : > { %1362 = vmatmul.mubr.msk.f32.vlgmr.msra.gmra.mxu0 %vm373_vm1, %v560_v32  ;;  %1399 = vmatprep.subr.mxu0 %v690_v37  ;;  %v977_v32 = vld [vmem:[%s1868_s7 + $0x28] sm:$0xff] }
  0x2f   : > { %1400 = vmatpush3.msra.mxu0 %v690_v37  ;;  %1378 = vmatprep.subr.mxu1 %v1179_v45  ;;  %v1194_v37 = vld [vmem:[%s1865_s4 + $0x138] sm:$0xff] }
  0x30   : > { %1401 = vmatprep.subr.mxu0 %v689_v38  ;;  %1379 = vmatpush3.msra.mxu1 %v1179_v45  ;;  %v1189_v45 = vld [vmem:[%s1865_s4 + $0x110] sm:$0xff] }
  0x31   : > { %1402 = vmatpush3.msra.mxu0 %v689_v38  ;;  %1380 = vmatprep.subr.mxu1 %v1178_v47  ;;  %v974_v38 = vld [vmem:[%s1868_s7 + $0x10] sm:$0xff] }
  0x32   : > { %1403 = vmatprep.subr.mxu0 %v688_v40  ;;  %1381 = vmatpush3.msra.mxu1 %v1178_v47  ;;  %v1187_v47 = vld [vmem:[%s1865_s4 + $0x100] sm:$0xff] }
  0x33   : > { %1404 = vmatpush3.msra.mxu0 %v688_v40  ;;  %1382 = vmatprep.subr.mxu1 %v1177_v48  ;;  %v973_v40 = vld [vmem:[%s1868_s7 + $0x8] sm:$0xff] }
  0x34   : > { %1405 = vmatprep.subr.mxu0 %v687_v43  ;;  %1383 = vmatpush3.msra.mxu1 %v1177_v48 }
  0x35   : > { %1406 = vmatpush3.msra.mxu0 %v687_v43  ;;  %1384 = vmatprep.subr.mxu1 %v1176_v49  ;;  %v1191_v43 = vld [vmem:[%s1865_s4 + $0x120] sm:$0xff] }
  0x36   : > { %1407 = vmatprep.subr.mxu0 %v686_v44  ;;  %1385 = vmatpush3.msra.mxu1 %v1176_v49 }
  0x37   : > { %1408 = vmatpush3.msra.mxu0 %v686_v44  ;;  %1386 = vmatprep.subr.mxu1 %v1175_v51  ;;  %v1190_v44 = vld [vmem:[%s1865_s4 + $0x118] sm:$0xff] }
  0x38   : > { %1409 = vmatprep.subr.mxu0 %v685_v46  ;;  %1387 = vmatpush3.msra.mxu1 %v1175_v51 }
  0x39   : > { %1410 = vmatpush3.msra.mxu0 %v685_v46  ;;  %1388 = vmatprep.subr.mxu1 %v1174_v53  ;;  %v1188_v46 = vld [vmem:[%s1865_s4 + $0x108] sm:$0xff] }
  0x3a   : > { %1411 = vmatprep.subr.mxu0 %v684_v50  ;;  %1389 = vmatpush3.msra.mxu1 %v1174_v53 }
  0x3b   : > { %1412 = vmatpush3.msra.mxu0 %v684_v50  ;;  %1390 = vmatprep.subr.mxu1 %v1173_v55  ;;  %v1207_v50 = vld [vmem:[%s1869_s8] ss:$0 sm:$0xff] }
  0x3c   : > { %1413 = vmatprep.subr.mxu0 %v683_v52  ;;  %1391 = vmatpush3.msra.mxu1 %v1173_v55  ;;  %v1203_v55 = vld [vmem:[%s1866_s5] ss:$0 sm:$0xff] }
  0x3d   : > { %1414 = vmatpush3.msra.mxu0 %v683_v52  ;;  %1392 = vmatprep.subr.mxu1 %v1172_v57 }
  0x3e   : > { %1415 = vmatprep.subr.mxu0 %v682_v54  ;;  %1393 = vmatpush3.msra.mxu1 %v1172_v57  ;;  %v1208_v57 = vld [vmem:[%s1870_s9] ss:$0 sm:$0xff] }
  0x3f   : > { %1416 = vmatpush3.msra.mxu0 %v682_v54  ;;  %1394 = vmatprep.subr.mxu1 %v1171_v59 }
  0x40   : > { %1417 = vmatprep.subr.mxu0 %v681_v56  ;;  %1395 = vmatpush3.msra.mxu1 %v1171_v59 }
  0x41   : > { %1418 = vmatpush3.msra.mxu0 %v681_v56  ;;  %1434 = vmatprep.subr.mxu1 %v1202_v61 }
  0x42   : > { %1419 = vmatprep.subr.mxu0 %v680_v58 }
  0x43   : > { %1420 = vmatpush3.msra.mxu0 %v680_v58 }
  0x44   : > { %1421 = vmatprep.subr.mxu0 %v679_v60 }
  0x45   : > { %1422 = vmatpush3.msra.mxu0 %v679_v60 }
  0x46   : > { %1423 = vmatprep.subr.mxu0 %v678_v62 }
  0x47   : > { %1424 = vmatpush3.msra.mxu0 %v678_v62 }
  0x48   : > { %1425 = vmatprep.subr.mxu0 %v677_v63 }
  0x49   : > { %1426 = vmatpush3.msra.mxu0 %v677_v63 }
  0x4a   : > { %1427 = vmatprep.subr.mxu0 %v676_v0 }
  0x4b   : > { %1428 = vmatpush3.msra.mxu0 %v676_v0 }
  0x4c   : > { %1429 = vmatprep.subr.mxu0 %v675_v1 }
  0x4d   : > { %1430 = vmatpush3.msra.mxu0 %v675_v1 }
  0x4e   : > { %1469 = vmatprep.subr.mxu0 %v979_v2 }
  0xdd   : > { %v1325_v3 = vpop.f32.mrf.mxu0 }
  0xde   : > { %v1344_v4 = vpop.f32.mrf.mxu1 }
  0xdf   : > { %v469_v5 = vpop.f32.mrf.mxu0  ;;  %v556_v7 = vadd.f32 %v1344_v4, %v1325_v3 }
  0xe0   : > { %v550_v6 = vpop.f32.mrf.mxu1 }
  0xe1   : > { %v551_v10 = vadd.f32 %v550_v6, %v469_v5 }
  0xee   : > { %v1363_v9 = vpop.f32.mrf.mxu0 }
  0xef   : > { %v652_v13 = vadd.f32 %v1363_v9, %v556_v7 }
  0xf0   : > { %v642_v15 = vpop.f32.mrf.mxu0 }
  0xf1   : > { %v660_v16 = vmul.f32 %v1169_v8, %v652_v13  ;;  %v651_v17 = vadd.f32 %v642_v15, %v551_v10 }
  0xf3   : > { %v668_v18 = vadd.f32 %v1170_v14, %v660_v16  ;;  %v659_v19 = vmul.f32 %v1169_v8, %v651_v17 }
  0xf5   : > { %v670_v20 = vmax.f32 %v668_v18, 0.0  ;;  %v667_v21 = vadd.f32 %v1170_v14, %v659_v19 }
  0xf7   : > { %672 = vst [vmem:[#allocation3 + $0x9] sm:$0xff] %v670_v20  ;;  %v669_v22 = vmax.f32 %v667_v21, 0.0 }
  0xf9   : > { %671 = vst [vmem:[#allocation3 + $0x1] sm:$0xff] %v669_v22  ;;  %1396 = vmatprep.mubr.f32.mxu1 %v669_v22 }
  0xfa   : > { %1397 = vmatmul.mubr.f32.vlgmr.msra.gmra.mxu1 %v670_v20 }
  0xfb   : > { %1435 = vmatpush3.msra.mxu1 %v1202_v61  ;;  %v1204_v61 = vld [vmem:[%s1867_s6] ss:$0 sm:$0xff] }
  0xfc   : > { %1436 = vmatprep.subr.mxu1 %v1201_v23 }
  0xfd   : > { %1437 = vmatpush3.msra.mxu1 %v1201_v23 }
  0xfe   : > { %1438 = vmatprep.subr.mxu1 %v1200_v24 }
  0xff   : > { %1439 = vmatpush3.msra.mxu1 %v1200_v24 }
 0x100   : > { %v673_v27 = vld [vmem:[#allocation3] sm:$0xff]  ;;  %v674_v28 = vld [vmem:[#allocation3 + $0x8] sm:$0xff]  ;;  %1440 = vmatprep.subr.mxu1 %v1199_v25 }
 0x101   : > { %v860_v29 = vld [vmem:[#allocation3 + $0x2] sm:$0xff]  ;;  %1431 = vmatprep.mubr.f32.mxu0 %v673_v27  ;;  %1441 = vmatpush3.msra.mxu1 %v1199_v25 }
 0x102   : > { %1466 = vmatprep.mubr.f32.mxu1 %v860_v29  ;;  %1432 = vmatmul.mubr.f32.vlgmr.msra.gmra.mxu0 %v674_v28 }
 0x103   : > { %1442 = vmatprep.subr.mxu1 %v1198_v26  ;;  %1470 = vmatpush3.msra.mxu0 %v979_v2 }
 0x104   : > { %1443 = vmatpush3.msra.mxu1 %v1198_v26  ;;  %1471 = vmatprep.subr.mxu0 %v978_v30 }
 0x105   : > { %1444 = vmatprep.subr.mxu1 %v1197_v31  ;;  %1472 = vmatpush3.msra.mxu0 %v978_v30 }
 0x106   : > { %1445 = vmatpush3.msra.mxu1 %v1197_v31  ;;  %1473 = vmatprep.subr.mxu0 %v977_v32 }
 0x107   : > { %1446 = vmatprep.subr.mxu1 %v1196_v33  ;;  %1474 = vmatpush3.msra.mxu0 %v977_v32 }
 0x108   : > { %1447 = vmatpush3.msra.mxu1 %v1196_v33  ;;  %1475 = vmatprep.subr.mxu0 %v976_v34 }
 0x109   : > { %1448 = vmatprep.subr.mxu1 %v1195_v35  ;;  %1476 = vmatpush3.msra.mxu0 %v976_v34 }
 0x10a   : > { %1449 = vmatpush3.msra.mxu1 %v1195_v35  ;;  %1477 = vmatprep.subr.mxu0 %v975_v36 }
 0x10b   : > { %1450 = vmatprep.subr.mxu1 %v1194_v37  ;;  %1478 = vmatpush3.msra.mxu0 %v975_v36 }
 0x10c   : > { %1451 = vmatpush3.msra.mxu1 %v1194_v37  ;;  %1479 = vmatprep.subr.mxu0 %v974_v38 }
 0x10d   : > { %1452 = vmatprep.subr.mxu1 %v1193_v39  ;;  %1480 = vmatpush3.msra.mxu0 %v974_v38 }
 0x10e   : > { %1453 = vmatpush3.msra.mxu1 %v1193_v39  ;;  %1481 = vmatprep.subr.mxu0 %v973_v40 }
 0x10f   : > { %1454 = vmatprep.subr.mxu1 %v1192_v41  ;;  %1482 = vmatpush3.msra.mxu0 %v973_v40 }
 0x110   : > { %1455 = vmatpush3.msra.mxu1 %v1192_v41  ;;  %1483 = vmatprep.subr.mxu0 %v972_v42 }
 0x111   : > { %1456 = vmatprep.subr.mxu1 %v1191_v43  ;;  %1484 = vmatpush3.msra.mxu0 %v972_v42 }
 0x112   : > { %1457 = vmatpush3.msra.mxu1 %v1191_v43  ;;  %1485 = vmatprep.mubr.msk.f32.mxu0 %vm373_vm1, %v1607_v11  ;;  %v861_v11 = vld [vmem:[#allocation3 + $0xa] sm:$0xff] }
 0x113   : > { %1458 = vmatprep.subr.mxu1 %v1190_v44  ;;  %1486 = vmatmul.mubr.msk.f32.vlgmr.msra.gmra.mxu0 %vm373_vm1, %v1609_v12 }
 0x114   : > { %1459 = vmatpush3.msra.mxu1 %v1190_v44 }
 0x115   : > { %1460 = vmatprep.subr.mxu1 %v1189_v45 }
 0x116   : > { %1461 = vmatpush3.msra.mxu1 %v1189_v45 }
 0x117   : > { %1462 = vmatprep.subr.mxu1 %v1188_v46 }
 0x118   : > { %1463 = vmatpush3.msra.mxu1 %v1188_v46 }
 0x119   : > { %1464 = vmatprep.subr.mxu1 %v1187_v47 }
 0x11a   : > { %1465 = vmatpush3.msra.mxu1 %v1187_v47 }
 0x11b   : > { %1467 = vmatmul.mubr.f32.vlgmr.msra.gmra.mxu1 %v861_v11 }
 0x1ba   : > { %v1398_v49 = vpop.f32.mrf.mxu1 }
 0x1bc   : > { %v776_v52 = vpop.f32.mrf.mxu1 }
 0x1c2   : > { %v1433_v48 = vpop.f32.mrf.mxu0 }
 0x1c3   : > { %v857_v53 = vadd.f32 %v1433_v48, %v1398_v49 }
 0x1c4   : > { %v851_v12 = vpop.f32.mrf.mxu0 }
 0x1c5   : > { %v852_v59 = vadd.f32 %v851_v12, %v776_v52 }
 0x1d3   : > { %v1487_v51 = vpop.f32.mrf.mxu0 }
 0x1d4   : > { %v1068_v54 = vmul.f32 %v1487_v51, %v1207_v50 }
 0x1d5   : > { %v1052_v58 = vpop.f32.mrf.mxu0 }
 0x1d6   : > { %v1076_v0 = vadd.f32 %v1208_v57, %v1068_v54  ;;  %v1067_v2 = vmul.f32 %v1207_v50, %v1052_v58 }
 0x1d8   : > { %v1075_v7 = vadd.f32 %v1208_v57, %v1067_v2 }
 0x1db   : > { %v1468_v56 = vpop.f32.mrf.mxu1 }
 0x1dc   : > { %v955_v60 = vadd.f32 %v1468_v56, %v857_v53 }
 0x1dd   : > { %v945_v62 = vpop.f32.mrf.mxu1 }
 0x1de   : > { %v963_v63 = vmul.f32 %v1203_v55, %v955_v60  ;;  %v954_v1 = vadd.f32 %v945_v62, %v852_v59 }
 0x1e0   : > { %v971_v3 = vadd.f32 %v1204_v61, %v963_v63  ;;  %v962_v4 = vmul.f32 %v1203_v55, %v954_v1 }
 0x1e2   : > { %v1078_v5 = vadd.f32 %v1076_v0, %v971_v3  ;;  %v970_v6 = vadd.f32 %v1204_v61, %v962_v4 }
 0x1e4   : > { %v1080_v8 = vmax.f32 %v1078_v5, 0.0  ;;  %v1077_v9 = vadd.f32 %v1075_v7, %v970_v6 }
 0x1e6   : > { %1082 = vst [vmem:[%s359_s22 + $0x8] sm:$0xff] %v1080_v8  ;;  %v1079_v10 = vmax.f32 %v1077_v9, 0.0 }
 0x1e8   : > { %1081 = vst [vmem:[%s359_s22] sm:$0xff] %v1079_v10 }
 0x1e9 PF: > { %s20_s13 = sadd.s32 1, %s1503_s13  }
 0x1ea   : > { %p17_p4 = scmp.ge.s32.totalorder %s20_s13, 4  }
 0x1ec   :  { %19 = sbr.rel (!%p17_p4) target bundleno = 1 (0x1), region = 94 }

</bundles_post_ra>
